<compile_context>
chip_gen: v7x
topology: tpu7x:2x2x1
jax: 0.10.0
libtpu: 0.0.40
codegen_flags: <defaults>
</compile_context>

<pallas_src>
import functools

import jax
import jax.numpy as jnp
from jax.experimental import pallas as pl
from jax.experimental.pallas import tpu as pltpu


def _round_up(x, m):
    return ((x + m - 1) // m) * m


def _vmem_limit_bytes():
    """Generation-aware VMEM budget: ~75% of physical (48 MiB v7x, ~96 MiB v5e/v6e)."""
    try:
        cap = getattr(pltpu.get_tpu_info(), "vmem_capacity_bytes", None)
        if cap:
            return int(min(cap * 3 // 4, 100 * 1024 * 1024))
    except Exception:
        pass
    return 48 * 1024 * 1024


def fused_mlp_kernel(x_ref, w_ref, b_ref, o_ref, act_ref, *, n_layers, node_norm):
    """All MLP layers in one kernel.

    Grid: (i = M tile, l = layer); layer axis innermost / "arbitrary".
    The activation is carried across layers in VMEM scratch (act_ref).
    BN (eval) is already folded into w_ref / b_ref by the caller; dropout in
    eval mode is the identity.
    """
    l = pl.program_id(1)

    @pl.when(l == 0)
    def _load_input():
        act_ref[...] = x_ref[...]                       # f32 [tm, d_pad]

    h = jnp.maximum(act_ref[...], 0.0)                  # F.relu (f32, v5e-safe)

    # bf16 MXU inputs, f32 accumulation.
    y = jnp.dot(h.astype(jnp.bfloat16), w_ref[0],
                preferred_element_type=jnp.float32)

    if node_norm:
        # (h / (1e-12 + ||h||)) @ W  ==  (h @ W) / (1e-12 + ||h||)
        ssq = jnp.sum(h * h, axis=-1, keepdims=True)    # f32 row sum-of-squares
        inv = pl.reciprocal(1e-12 + jnp.sqrt(ssq), approx=True)   # EUP slot
        y = y * inv

    y = y + b_ref[0]                                    # nn.Linear (+ BN fold)
    act_ref[...] = y                                    # carry to next layer

    @pl.when(l == n_layers - 1)
    def _store_output():
        o_ref[...] = y.astype(o_ref.dtype)


def prepare_params(params, *, use_bn, bn_eps=1e-5):
    """One-time prep (outside the jitted forward): transpose, fold eval-mode BN
    into (W, b), lane-pad to a common width, cast W to bf16, stack all layers."""
    if not params:
        return None
    d_pad = _round_up(max(d for p in params for d in p["w"].shape), 128)
    w_stack, b_stack = [], []
    for p in params:
        w_t = p["w"].T.astype(jnp.float32)              # [D_in, D_out]
        b = p["b"].astype(jnp.float32)
        if use_bn:
            inv_std = 1.0 / jnp.sqrt(p["rv"] + bn_eps)
            scale = p["gamma"] * inv_std                # per input feature
            shift = p["beta"] - p["rm"] * scale
            w_eff = scale[:, None] * w_t
            b_eff = shift @ w_t + b
        else:
            w_eff, b_eff = w_t, b
        d_in, d_out = w_eff.shape
        w_stack.append(jnp.pad(w_eff, ((0, d_pad - d_in), (0, d_pad - d_out))
                               ).astype(jnp.bfloat16))  # halves weight DMA
        b_stack.append(jnp.pad(b_eff, (0, d_pad - d_out)).reshape(1, d_pad))
    return jnp.stack(w_stack), jnp.stack(b_stack)       # [L,d,d] bf16, [L,1,d] f32


def mlp_forward(X, w_stack, b_stack, *, num_classes, node_norm, tile_m=256):
    """Whole MLP forward as one pallas_call."""
    N, d_feat = X.shape
    L, d_pad, _ = w_stack.shape

    # M tiling: multiples of 8 (f32 sublanes).  tile_m=256 keeps big MXU passes
    # while batches >= 512 rows still give >= 2 "parallel" tiles for v7x megacore.
    tm = min(tile_m, _round_up(N, 8))
    n_pad = _round_up(N, tm)

    vmem_limit = _vmem_limit_bytes()
    # Double-buffered x / W / b / out + activation scratch.
    need = (2 * tm * d_pad * 4 + 2 * d_pad * d_pad * 2 + 2 * d_pad * 4
            + 2 * tm * d_pad * 4 + tm * d_pad * 4)
    if need > vmem_limit:
        # TODO(synk): fall back to a K/N-tiled per-layer kernel for huge widths.
        raise NotImplementedError("padded feature width too large for fused kernel")

    # Pad once on entry (zeros are inert: relu(0)=0, padded W rows/cols are 0).
    xp = jnp.pad(X.astype(jnp.float32), ((0, n_pad - N), (0, d_pad - d_feat)))

    kernel = functools.partial(fused_mlp_kernel, n_layers=L, node_norm=node_norm)

    cost = pl.CostEstimate(
        flops=2 * n_pad * d_pad * d_pad * L,
        transcendentals=2 * n_pad * L if node_norm else 0,
        bytes_accessed=(xp.size * 4 + w_stack.size * 2 + b_stack.size * 4
                        + n_pad * d_pad * 4),
    )

    out = pl.pallas_call(
        kernel,
        out_shape=jax.ShapeDtypeStruct((n_pad, d_pad), jnp.float32),
        grid_spec=pltpu.PrefetchScalarGridSpec(
            num_scalar_prefetch=0,
            grid=(n_pad // tm, L),
            in_specs=[
                pl.BlockSpec((tm, d_pad), lambda i, l: (i, 0)),          # X tile (fetched once per i)
                pl.BlockSpec((1, d_pad, d_pad), lambda i, l: (l, 0, 0)),  # W_l (bf16)
                pl.BlockSpec((1, 1, d_pad), lambda i, l: (l, 0, 0)),      # b_l (f32)
            ],
            out_specs=pl.BlockSpec((tm, d_pad), lambda i, l: (i, 0)),
            scratch_shapes=[pltpu.VMEM((tm, d_pad), jnp.float32)],        # carried activation
        ),
        compiler_params=pltpu.CompilerParams(
            dimension_semantics=("parallel", "arbitrary"),
            vmem_limit_bytes=vmem_limit,
        ),
        cost_estimate=cost,
    )(xp, w_stack, b_stack)

    # Single slice at the very end.
    return out[:N, :num_classes]


def init_params(key, hidden_size, num_classes, nlayers):
    """Deterministic init of fcs / bns (embeds unused by forward)."""
    dims = [(hidden_size, hidden_size)] * (nlayers - 2) + \
           [(hidden_size, num_classes)]
    params = []
    for d_in, d_out in dims:
        key, kw, kb, kg, kbe, krm, krv = jax.random.split(key, 7)
        w = jax.random.normal(kw, (d_out, d_in), jnp.float32) * 0.1   # torch (out,in)
        b = jax.random.normal(kb, (d_out,), jnp.float32) * 0.1
        gamma = 1.0 + 0.1 * jax.random.normal(kg, (hidden_size,), jnp.float32)
        beta = 0.1 * jax.random.normal(kbe, (hidden_size,), jnp.float32)
        running_mean = 0.1 * jax.random.normal(krm, (hidden_size,), jnp.float32)
        running_var = jnp.abs(1.0 + 0.1 * jax.random.normal(
            krv, (hidden_size,), jnp.float32))
        params.append(dict(w=w, b=b, gamma=gamma, beta=beta,
                           rm=running_mean, rv=running_var))
    return params


def mlp_forward_ref(X, params, *, use_bn, node_norm, bn_eps=1e-5):
    """Pure-JAX f32 reference of the PyTorch module's eval forward."""
    embs = X
    for p in params:
        h = jnp.maximum(embs, 0.0)
        if node_norm:
            h = h / (1e-12 + jnp.linalg.norm(h, axis=-1, keepdims=True))
        if use_bn:
            h = (h - p["rm"]) / jnp.sqrt(p["rv"] + bn_eps) * p["gamma"] + p["beta"]
        embs = h @ p["w"].T + p["b"]
    return embs


if __name__ == "__main__":
    # Small, forward-consistent config.
    N = 8              # number of nodes (batch rows)
    hidden_size = 32
    num_classes = 16
    nlayers = 3        # -> 2 fused (fc, bn) layers in forward
    use_bn = True
    node_norm = True

    key = jax.random.PRNGKey(0)
    kx, kp = jax.random.split(key)
    X = jax.random.normal(kx, (N, hidden_size), jnp.float32)
    params = init_params(kp, hidden_size, num_classes, nlayers)

    # One-time weight prep (transpose + BN fold + pad + bf16 + stack).
    w_stack, b_stack = prepare_params(params, use_bn=use_bn)

    fwd = jax.jit(functools.partial(mlp_forward,
                                    num_classes=num_classes,
                                    node_norm=node_norm))
    out = jax.block_until_ready(fwd(X, w_stack, b_stack))

    ref = mlp_forward_ref(X, params, use_bn=use_bn, node_norm=node_norm)
    assert out.shape == (N, num_classes)
    # bf16 MXU inputs + approximate reciprocal -> loosened tolerance vs f32 ref.
    assert jnp.allclose(out, ref, atol=2e-2, rtol=2e-2), "mismatch vs reference"

    print("KERNEL_OK")
</pallas_src>

<mosaic_0001>
module attributes {stable_mosaic.version = 11 : i64} {
  func.func @fused_mlp_kernel(%arg0: i32, %arg1: i32, %arg2: memref<8x128xf32, #tpu.memory_space<vmem>>, %arg3: memref<1x128x128xbf16, #tpu.memory_space<vmem>>, %arg4: memref<1x1x128xf32, #tpu.memory_space<vmem>>, %arg5: memref<8x128xf32, #tpu.memory_space<vmem>>, %arg6: memref<8x128xf32, #tpu.memory_space<vmem>>) attributes {dimension_semantics = [#tpu.dimension_semantics<parallel>, #tpu.dimension_semantics<arbitrary>], iteration_bounds = array<i64: 1, 2>, scalar_prefetch = 0 : i64, scratch_operands = 1 : i64, tpu.core_type = #tpu.core_type<tc>, window_params = [{transform_indices = @transform_0, window_bounds = array<i64: 8, 128>}, {transform_indices = @transform_1, window_bounds = array<i64: 1, 128, 128>}, {transform_indices = @transform_2, window_bounds = array<i64: 1, 1, 128>}, {transform_indices = @transform_3, window_bounds = array<i64: 8, 128>}]} {
    %c0_i32 = arith.constant 0 : i32
    %0 = arith.cmpi eq, %arg1, %c0_i32 : i32
    %1 = arith.extui %0 : i1 to i32
    %c0_i32_0 = arith.constant 0 : i32
    %2 = arith.cmpi ne, %1, %c0_i32_0 : i32
    scf.if %2 {
      %c0_14 = arith.constant 0 : index
      %c0_15 = arith.constant 0 : index
      %27 = vector.load %arg2[%c0_14, %c0_15] : memref<8x128xf32, #tpu.memory_space<vmem>>, vector<8x128xf32>
      %c0_16 = arith.constant 0 : index
      %c0_17 = arith.constant 0 : index
      %28 = vector.load %arg6[%c0_16, %c0_17] : memref<8x128xf32, #tpu.memory_space<vmem>>, vector<8x128xf32>
      tpu.vector_store %arg6[%c0_16, %c0_17], %27 {strides = array<i32>} : memref<8x128xf32, #tpu.memory_space<vmem>>, vector<8x128xf32>,
    } else {
    }
    %c0 = arith.constant 0 : index
    %c0_1 = arith.constant 0 : index
    %3 = vector.load %arg6[%c0, %c0_1] : memref<8x128xf32, #tpu.memory_space<vmem>>, vector<8x128xf32>
    %cst = arith.constant 0.000000e+00 : f32
    %4 = vector.broadcast %cst : f32 to vector<8x128xf32>
    %5 = arith.maximumf %3, %4 : vector<8x128xf32>
    %6 = arith.truncf %5 : vector<8x128xf32> to vector<8x128xbf16>
    %c0_2 = arith.constant 0 : index
    %c0_3 = arith.constant 0 : index
    %c0_4 = arith.constant 0 : index
    %7 = vector.load %arg3[%c0_2, %c0_3, %c0_4] : memref<1x128x128xbf16, #tpu.memory_space<vmem>>, vector<1x128x128xbf16>
    %8 = vector.shape_cast %7 : vector<1x128x128xbf16> to vector<128x128xbf16>
    %cst_5 = arith.constant dense<0.000000e+00> : vector<8x128xf32>
    %9 = tpu.matmul %6, %8, %cst_5 {dimension_numbers = #tpu.dot_dimension_numbers<[1], [0], [0], [1], [0, 0, 1, 1], [], []>} : vector<8x128xbf16>, vector<128x128xbf16>, vector<8x128xf32> -> vector<8x128xf32>
    %10 = arith.mulf %5, %5 : vector<8x128xf32>
    %cst_6 = arith.constant dense<0.000000e+00> : vector<8xf32>
    %11 = vector.multi_reduction <add>, %10, %cst_6 [1] : vector<8x128xf32> to vector<8xf32>
    %12 = vector.shape_cast %11 : vector<8xf32> to vector<8x1xf32>
    %13 = math.sqrt %12 : vector<8x1xf32>
    %cst_7 = arith.constant 9.99999996E-13 : f32
    %14 = vector.broadcast %cst_7 : f32 to vector<8x1xf32>
    %15 = arith.addf %14, %13 : vector<8x1xf32>
    %16 = tpu.reciprocal %15 {approx = true} : vector<8x1xf32> -> vector<8x1xf32>
    %17 = vector.broadcast %16 : vector<8x1xf32> to vector<8x128xf32>
    %18 = arith.mulf %9, %17 : vector<8x128xf32>
    %c0_8 = arith.constant 0 : index
    %c0_9 = arith.constant 0 : index
    %c0_10 = arith.constant 0 : index
    %19 = vector.load %arg4[%c0_8, %c0_9, %c0_10] : memref<1x1x128xf32, #tpu.memory_space<vmem>>, vector<1x1x128xf32>
    %20 = vector.shape_cast %19 : vector<1x1x128xf32> to vector<1x128xf32>
    %21 = vector.broadcast %20 : vector<1x128xf32> to vector<8x128xf32>
    %22 = arith.addf %18, %21 : vector<8x128xf32>
    %c0_11 = arith.constant 0 : index
    %c0_12 = arith.constant 0 : index
    %23 = vector.load %arg6[%c0_11, %c0_12] : memref<8x128xf32, #tpu.memory_space<vmem>>, vector<8x128xf32>
    tpu.vector_store %arg6[%c0_11, %c0_12], %22 {strides = array<i32>} : memref<8x128xf32, #tpu.memory_space<vmem>>, vector<8x128xf32>,
    %c1_i32 = arith.constant 1 : i32
    %24 = arith.cmpi eq, %arg1, %c1_i32 : i32
    %25 = arith.extui %24 : i1 to i32
    %c0_i32_13 = arith.constant 0 : i32
    %26 = arith.cmpi ne, %25, %c0_i32_13 : i32
    scf.if %26 {
      %c0_14 = arith.constant 0 : index
      %c0_15 = arith.constant 0 : index
      %27 = vector.load %arg5[%c0_14, %c0_15] : memref<8x128xf32, #tpu.memory_space<vmem>>, vector<8x128xf32>
      tpu.vector_store %arg5[%c0_14, %c0_15], %22 {strides = array<i32>} : memref<8x128xf32, #tpu.memory_space<vmem>>, vector<8x128xf32>,
    } else {
    }
    return
  }
  func.func @transform_0(%arg0: i32, %arg1: i32) -> (i32, i32) {
    %c0_i32 = arith.constant 0 : i32
    %c0_i32_0 = arith.constant 0 : i32
    return %arg0, %c0_i32 : i32, i32
  }
  func.func @transform_1(%arg0: i32, %arg1: i32) -> (i32, i32, i32) {
    %c0_i32 = arith.constant 0 : i32
    %c0_i32_0 = arith.constant 0 : i32
    %c0_i32_1 = arith.constant 0 : i32
    return %arg1, %c0_i32, %c0_i32_0 : i32, i32, i32
  }
  func.func @transform_2(%arg0: i32, %arg1: i32) -> (i32, i32, i32) {
    %c0_i32 = arith.constant 0 : i32
    %c0_i32_0 = arith.constant 0 : i32
    %c0_i32_1 = arith.constant 0 : i32
    return %arg1, %c0_i32, %c0_i32_0 : i32, i32, i32
  }
  func.func @transform_3(%arg0: i32, %arg1: i32) -> (i32, i32) {
    %c0_i32 = arith.constant 0 : i32
    %c0_i32_0 = arith.constant 0 : i32
    return %arg0, %c0_i32 : i32, i32
  }
}

</mosaic_0001>

<bundles_post_ra>
// kernel: mlp_forward.1
= control target key start
LH: loop header
LB: loop body
LE: loop exit
PB: predicated region body
PF: predicated region fallthrough
CT: control target
= control target key end

     0   :  { %8 = vsyncpa [#allocation4], 0  ;;  %s907_s0 = inlined_call_operand.vmem [shape: f32[8,128], index: 0, kind: input, shape index: {}]   ;;  %s908_s1 = inlined_call_operand.hbm [shape: bf16[2,128,128], index: 1, kind: input, shape index: {}]   ;;  %s909_s2 = inlined_call_operand.vmem [shape: f32[2,1,128], index: 2, kind: input, shape index: {}]   ;;  %s910_s3 = inlined_call_operand.hbm [shape: f32[8,128], index: 3, kind: output, shape index: {}]  }
   0x1   :  { %10 = vsyncpa [#allocation4 + $0x1], 0 }
   0x2   :  { %11 = vsyncpa [#allocation5], 0  ;;  %s730_s12 = smov 0   ;;  %s732_s13 = smov 0  }
   0x3   :  { %s734_s14 = smov 0   ;;  %s736_s15 = smov 0  }
   0x4   :  { %s738_s16 = smov 0   ;;  %s740_s17 = smov 0  }
   0x5 LB: > { %s460_s18 = sadd.s32 4294967295, %s702_s17   ;;  %s26_s19 = sadd.s32 1, %s698_s16  ;;  %s702_s17 = sphi %s740_s17, %s17_s17   ;;  %s698_s16 = sphi %s738_s16, %s919_s16   ;;  %s694_s15 = sphi %s736_s15, %s918_s15   ;;  %s690_s14 = sphi %s734_s14, %s917_s14   ;;  %s686_s13 = sphi %s732_s13, %s916_s13   ;;  %s682_s12 = sphi %s730_s12, %s915_s12  }
   0x6   : > { %p27_p0 = scmp.ge.s32.totalorder %s26_s19, 2  ;;  %s62_s20 = sadd.s32 1, %s690_s14 }
   0x7   : > { %p69_p1 = scmp.ne.s32.totalorder %s690_s14, %s686_s13  ;;  %p70_p2 = scmp.eq.s32.totalorder %s702_s17, 0 }
   0x8   : > { %s921_s19 = smov (%p27_p0, %s26_s19), 0  ;;  %p75_p4 = scmp.ne.s32.totalorder %s686_s13, %s682_s12 }
   0x9   : > { %p766_p3 = por %p70_p2, %p69_p1  ;;  %s59_s22 = ssub.s32 %s698_s16, %s921_s19 }
   0xa   : > { %p76_p5 = scmp.eq.s32.totalorder %s460_s18, 0  ;;  %p60_p6 = scmp.eq.s32.totalorder %s59_s22, 0 }
   0xb   : > { %p524_p8 = scmp.lt.s32.totalorder %s702_s17, 2  ;;  %s158_s25 = sand.u32 1, %s690_s14  }
   0xc   : > { %p775_p7 = por %p76_p5, %p75_p4  ;;  %s484_s26 = sshll.u32 %s698_s16, 10 }
   0xd   : > { %s781_s24 = scalar_select %p60_p6, %s690_s14, %s62_s20  }
   0xe   : > { %s464_s27 = sshll.u32 %s158_s25, 6  ;;  %s788_s30 = scalar_lea.hbm %s908_s1, %s484_s26 }
   0xf   : > { %s162_s4 = scalar_lea.vmem [#allocation3], %s464_s27  ;;  %p792_p9 = pnand %p524_p8, %p766_p3 }
  0x10   : > { %s169_s5 = sshll.u32 %s162_s4, 4  ;;  %s798_s7 = scalar_lea.sflag [#allocation4], %s158_s25  ;;  %s796_s5 = int_to_ptr.vmem [resolvable:$true] %s169_s5 }
  0x11   : > { %s592_s8 = scalar_lea.hbm %s788_s30, 1024  ;;  %p594_p11 = pneg %p792_p9 }
  0x12   : > { %p593_p10 = scmp.ne.s32.totalorder %s788_s30, %s592_s8  ;;  %s597_s11 = scalar_lea.hbm %s908_s1, 2048 }
  0x13   : > { %p598_p0 = scmp.lt.u32.totalorder %s788_s30, %s908_s1  ;;  %p599_p1 = scmp.lt.u32.totalorder %s597_s11, %s592_s8 }
  0x14   : > { %p595_p12 = pnand %p594_p11, %p593_p10  ;;  %p601_p3 = scmp.lt.u32.totalorder %s592_s8, %s788_s30 }
  0x15   : > { %p600_p2 = por %p599_p1, %p598_p0 }
  0x16   : > { %p596_p13 = pneg %p595_p12 }
  0x17   : > { %p602_p4 = por %p601_p3, %p600_p2 }
  0x19   : > { %p603_p5 = pnand %p602_p4, %p596_p13 }
  0x1b   : > { %606 = shalt.err (!%p603_p5)
}
  0x1c   : > { %s607_s21 = scalar_lea.vmem %s796_s5, 1024  ;;  %s704_s22 = smov [#allocation3]  }
  0x1d   : > { %p608_p6 = scmp.ne.s32.totalorder %s796_s5, %s607_s21  ;;  %s612_s25 = sshll.u32 %s704_s22, 4  ;;  %s613_s25 = int_to_ptr.vmem [resolvable:$false] %s612_s25 }
  0x1e   : > { %s614_s26 = scalar_lea.vmem %s613_s25, 2048  ;;  %p615_p12 = scmp.lt.s32.totalorder %s796_s5, %s613_s25 }
  0x1f   : > { %p610_p8 = pnand %p608_p6, %p594_p11  ;;  %p616_p0 = scmp.lt.s32.totalorder %s614_s26, %s607_s21 }
  0x21   : > { %p611_p10 = pneg %p610_p8  ;;  %p617_p1 = por %p616_p0, %p615_p12 }
  0x23   : > { %p618_p2 = pnand %p617_p1, %p611_p10 }
  0x25   : > { %621 = shalt.err (!%p618_p2)
}
  0x26   : > { %s705_s27 = smov 64   ;;  %s706_s28 = smov 4  }
  0x27   : > { %523 = dma.hbm_to_vmem [thread:$0]  (!%p792_p9), %s788_s30, 1024, %s796_s5, %s798_s7, %s705_s27, %s705_s27, %s706_s28  }
  0x28   : > { %p467_p11 = scmp.ge.s32.totalorder %s702_s17, 1  ;;  %p183_p13 = scmp.lt.s32.totalorder %s702_s17, 3 }
  0x2a   : > { %p184_p3 = pnand %p467_p11, %p183_p13 }
  0x2b   : > { %s189_s29 = sand.u32 (!%p184_p3), 1, %s686_s13  }
  0x2c   : > { %187 = sbr.rel (%p184_p3) target bundleno = 337 (0x151), region = 32  ;;  %s468_s4 = sshll.u32 (!%p184_p3), %s189_s29, 6 }
  0x2d   : > { %s190_s8 = scalar_lea.sflag (!%p184_p3), [#allocation4], %s189_s29  ;;  %s829_s9 = scalar_lea.vmem (!%p184_p3), [#allocation3], %s468_s4 }
  0x33   : > { %673 = dma.done.wait (%p775_p7), %s190_s8, 1024  }
  0x34   : > { %675 = vsyncadd (%p775_p7), %s190_s8, 4294966272  ;;  %p222_p4 = scmp.lt.s32.totalorder %s694_s15, 1  ;;  %p469_p9 = scmp.ne.s32.totalorder %s694_s15, 0 }
  0x35   : > { %v230_v0 = vld [vmem:[%s907_s0] sm:$0xff] (!%p469_p9) }
  0x36   : > { %s837_s30 = scalar_select %p222_p4, %s694_s15, 1 }
  0x37   : > { %229 = sbr.rel (%p469_p9) target bundleno = 62 (0x3e), region = 40  ;;  %231 = vst [vmem:[#allocation2] sm:$0xff] (!%p469_p9), %v230_v0 }
  0x38   : > { %s224_s7 = scalar_lea.vmem %s909_s2, %s837_s30 }
  0x3e PF: > { %v580_v1 = vld [vmem:[%s829_s9] sm:$0xff]   ;;  %v707_v2 = vmov 0.0   ;;  %v581_v3 = vld [vmem:[%s829_s9 + $0x8] sm:$0xff]   ;;  %vm708_vm0 = vmmov 0   ;;  %v582_v4 = vld [vmem:[%s829_s9 + $0x10] sm:$0xff]   ;;  %p479_p7 = scmp.ne.s32.totalorder %s694_s15, 1 }
  0x3f   : > { %494 = vmatprep.subr.bf16.mxu0 %v707_v2  ;;  %510 = vmatprep.mubr.msk.bf16.mxu0 %vm708_vm0, %v707_v2  ;;  %v232_v5 = vld [vmem:[#allocation2] sm:$0xff]  ;;  %v584_v9 = vld [vmem:[%s829_s9 + $0x20] sm:$0xff]   ;;  %v585_v10 = vld [vmem:[%s829_s9 + $0x28] sm:$0xff]  }
  0x40   : > { %495 = vmatpush3.bf16.msra.mxu0 %v580_v1  ;;  %v233_v6 = vmax.f32 %v232_v5, 0.0  ;;  %v583_v7 = vld [vmem:[%s829_s9 + $0x18] sm:$0xff]   ;;  %v586_v11 = vld [vmem:[%s829_s9 + $0x30] sm:$0xff]  }
  0x41   : > { %496 = vmatprep.subr.bf16.mxu0 %v707_v2  ;;  %v587_v12 = vld [vmem:[%s829_s9 + $0x38] sm:$0xff]   ;;  %v478_v23 = vld [vmem:[%s224_s7] ss:$0 sm:$0xff] }
  0x42   : > { %v339_v8 = vmul.f32 %v233_v6, %v233_v6  ;;  %v234_v13 = vpack.c.bf16 %v233_v6, %v233_v6 }
  0x44   : > { %497 = vmatpush3.bf16.msra.mxu0 %v581_v3  ;;  %340 = vadd.xlane.f32.xlu0 %v339_v8 }
  0x45   : > { %498 = vmatprep.subr.bf16.mxu0 %v707_v2 }
  0x48   : > { %499 = vmatpush3.bf16.msra.mxu0 %v582_v4 }
  0x49   : > { %500 = vmatprep.subr.bf16.mxu0 %v707_v2 }
  0x4c   : > { %501 = vmatpush3.bf16.msra.mxu0 %v583_v7 }
  0x4d   : > { %502 = vmatprep.subr.bf16.mxu0 %v707_v2 }
  0x50   : > { %503 = vmatpush3.bf16.msra.mxu0 %v584_v9 }
  0x51   : > { %504 = vmatprep.subr.bf16.mxu0 %v707_v2 }
  0x54   : > { %505 = vmatpush3.bf16.msra.mxu0 %v585_v10 }
  0x55   : > { %506 = vmatprep.subr.bf16.mxu0 %v707_v2 }
  0x58   : > { %507 = vmatpush3.bf16.msra.mxu0 %v586_v11 }
  0x59   : > { %508 = vmatprep.subr.bf16.mxu0 %v707_v2 }
  0x5c   : > { %509 = vmatpush3.bf16.msra.mxu0 %v587_v12 }
  0x5f   : > { %511 = vmatmul.mubr.bf16.vlgmr.msra.gmra.mrb[0].mxu0 %v234_v13 }
  0xd1   : > { %v341_v14 = vpop.xlane.xlu0 %340 }
  0xd2   : > { %588 = vrsqrt.f32 %v341_v14  ;;  %vm344_vm1 = vcmp.eq.f32.partialorder %v341_v14, inf  ;;  %v347_v17 = vand.u32 2147483648, %v341_v14  ;;  %vm346_vm2 = vcmp.eq.f32.partialorder %v341_v14, 0.0 }
  0xdc   : > { %v589_v15 = vpop.eup %588 }
  0xdd   : > { %v343_v16 = vmul.f32 %v589_v15, %v341_v14 }
  0xdf   : > { %v345_v18 = vsel %vm344_vm1, %v341_v14, %v343_v16 }
  0xe0   : > { %v348_v19 = vsel %vm346_vm2, %v347_v17, %v345_v18 }
  0xe1   : > { %v349_v20 = vadd.f32 1e-12, %v348_v19 }
  0xe3   : > { %590 = vrcp.f32 %v349_v20 }
  0xed   : > { %v591_v21 = vpop.eup %590 }
 0x131   : > { %364 = sbr.rel (%p479_p7) target bundleno = 312 (0x138), region = 44 }
 0x132   : > { %v333_v22 = vpop.f32.mrb[0].mxu0 }
 0x133   : > { %v351_v24 = vmul.f32 %v591_v21, %v333_v22  ;;  %v512_v25 = vpop.f32.mrb[1].mxu0 }
 0x134   : > { %v336_v26 = vpop.f32.mrb[2].mxu0 }
 0x135   : > { %v359_v27 = vadd.f32 %v478_v23, %v351_v24  ;;  %v513_v28 = vpop.f32.mrb[3].mxu0 }
 0x137   : > { %360 = vst [vmem:[#allocation2] sm:$0xff] %v359_v27  ;;  %365 = vst [vmem:[#allocation6] sm:$0xff] (!%p479_p7), %v359_v27 }
 0x138 PF: > { %p863_p5 = scmp.eq.s32.totalorder %s460_s18, 1  ;;  %s709_s21 = smov [#allocation6]  }
 0x139   : > { %s375_s22 = sshll.u32 %s709_s21, 4  ;;  %s376_s22 = int_to_ptr.vmem [resolvable:$true] %s375_s22 }
 0x13a   : > { %s622_s25 = scalar_lea.vmem %s376_s22, 128  ;;  %p629_p12 = scmp.lt.s32.totalorder %s376_s22, %s376_s22 }
 0x13b   : > { %p623_p6 = scmp.ne.s32.totalorder %s376_s22, %s622_s25  ;;  %p630_p0 = scmp.lt.s32.totalorder %s622_s25, %s622_s25 }
 0x13d   : > { %p624_p8 = pnand %p623_p6, %p863_p5  ;;  %p631_p1 = por %p630_p0, %p629_p12 }
 0x13f   : > { %p625_p10 = pneg %p624_p8 }
 0x141   : > { %p632_p2 = pnand %p631_p1, %p625_p10 }
 0x143   : > { %635 = shalt.err (!%p632_p2)
}
 0x144   : > { %s636_s18 = scalar_lea.hbm %s910_s3, 128 }
 0x145   : > { %p637_p11 = scmp.ne.s32.totalorder %s910_s3, %s636_s18  ;;  %p642_p4 = scmp.lt.u32.totalorder %s636_s18, %s910_s3 }
 0x147   : > { %p638_p13 = pnand %p637_p11, %p863_p5 }
 0x149   : > { %p639_p3 = pneg %p638_p13 }
 0x14b   : > { %p644_p9 = pnand %p642_p4, %p639_p3 }
 0x14d   : > { %647 = shalt.err (!%p644_p9)
}
 0x14e   : > { %517 = dma.vmem_to_hbm [thread:$0]  (%p863_p5), %s376_s22, 128, %s910_s3, [#allocation5]  }
 0x14f   : > { %677 = dma.done.wait (%p863_p5), [#allocation5], 128  }
 0x150   : > { %679 = vsyncadd (%p863_p5), [#allocation5], 4294967168 }
 0x151 PF: > { %s17_s17 = sadd.s32 1, %s702_s17   ;;  %s915_s12 = smov %s686_s13 }
 0x152   : > { %p14_p7 = scmp.ge.s32.totalorder %s17_s17, 4   ;;  %s916_s13 = smov %s690_s14 }
 0x153   : > { %s917_s14 = smov %s781_s24  ;;  %s918_s15 = smov %s698_s16 }
 0x154   : > { %s919_s16 = smov %s921_s19  ;;  %16 = sbr.rel (!%p14_p7) target bundleno = 5 (0x5), region = 84 }
 0x15b   :  { %388 = vsyncpa [#allocation4], 1 }
 0x15c   :  { %390 = vsyncpa [#allocation4 + $0x1], 1 }
 0x15d   :  { %391 = vsyncpa [#allocation5], 1 }
 0x15e   :  { %393 = vsyncpa [#allocation5 + $0x1], 1 }

</bundles_post_ra>
